<compile_context>
chip_gen: v6e
topology: v6e:2x2x1
jax: 0.10.0
libtpu: 0.0.40
codegen_flags: <defaults>
</compile_context>

<pallas_src>
import functools

import numpy as np
import jax
import jax.numpy as jnp
from jax.experimental import pallas as pl
from jax.experimental.pallas import tpu as pltpu

FEATURE_SIZE = 20
NUM_BBOXES = 2
LAMBDA_COORD = 5.0
LAMBDA_NOOBJ = 0.5


# ----------------------------- Pallas kernel -----------------------------------------------
def _loss_kernel(pred_ref, targ_ref, out_ref, *, lambda_coord, lambda_noobj):
    # pred_ref/targ_ref: (10, R, 128) f32 — channel c is one full (R, 128) tile (R multiple of 8).
    P = [pred_ref[c] for c in range(10)]
    T = [targ_ref[c] for c in range(10)]

    obj = T[4] > 0.0                                   # cell contains an object

    # --- no-object confidence term: conf channels 4 and 9 (padded cells all-zero -> 0) ------
    d4 = P[4] - T[4]
    d9 = P[9] - T[9]
    noobj_term = d4 * d4 + d9 * d9

    # --- responsible-box selection: IoU of each pred box vs target box 0 (as in the ref) ----
    def corners(x, y, w, h):
        w2 = w * w                                     # reference code squares w/h
        h2 = h * h
        return x - w2, y - h2, x + w2, y + h2

    # target-box-0 corners & area hoisted (shared by both IoU evaluations)
    tx1, ty1, tx2, ty2 = corners(T[0], T[1], T[2], T[3])
    at = (tx2 - tx1) * (ty2 - ty1)

    def inter_union(x, y, w, h):
        px1, py1, px2, py2 = corners(x, y, w, h)
        iw = jnp.maximum(jnp.minimum(px2, tx2) - jnp.maximum(px1, tx1), 0.0)
        ih = jnp.maximum(jnp.minimum(py2, ty2) - jnp.maximum(py1, ty1), 0.0)
        inter = iw * ih
        ap = (px2 - px1) * (py2 - py1)
        return inter, ap + at - inter                  # union >= 0 (areas are squares)

    i0, u0 = inter_union(P[0], P[1], P[2], P[3])
    i1, u1 = inter_union(P[5], P[6], P[7], P[8])
    # iou1 > iou0  <=>  i1*u0 > i0*u1  (exact; no divide, no NaN/inf path; ties -> box 0,
    # matching torch .max(0) first-index behavior).
    resp1 = i1 * u0 > i0 * u1

    # responsible pred/target box, selected per channel (full-vreg selects, no relayout)
    pr = [jnp.where(resp1, P[5 + c], P[c]) for c in range(5)]
    tr = [jnp.where(resp1, T[5 + c], T[c]) for c in range(5)]

    dx = pr[0] - tr[0]
    dy = pr[1] - tr[1]
    position = dx * dx + dy * dy
    dw = jnp.sqrt(pr[2]) - jnp.sqrt(tr[2])             # NaN for negative w/h only in non-obj
    dh = jnp.sqrt(pr[3]) - jnp.sqrt(tr[3])             # cells -> masked by the select below
    dimension = dw * dw + dh * dh
    dc = pr[4] - tr[4]
    contain = dc * dc

    # --- fuse into one masked per-cell contribution; single full-vreg reduction -------------
    cell = jnp.where(obj,
                     contain + lambda_coord * (position + dimension),
                     lambda_noobj * noobj_term)
    out_ref[0, 0] = jnp.sum(cell)


@jax.jit
def yolo_loss_pallas(pred_tiles, targ_tiles):
    """pred_tiles, targ_tiles: (10, R, 128) f32 channel-major tiles -> scalar total loss."""
    out = pl.pallas_call(
        functools.partial(_loss_kernel,
                          lambda_coord=LAMBDA_COORD, lambda_noobj=LAMBDA_NOOBJ),
        out_shape=jax.ShapeDtypeStruct((1, 1), jnp.float32),
        in_specs=[pl.BlockSpec(memory_space=pltpu.MemorySpace.VMEM),
                  pl.BlockSpec(memory_space=pltpu.MemorySpace.VMEM)],
        out_specs=pl.BlockSpec(memory_space=pltpu.MemorySpace.SMEM),
    )(pred_tiles, targ_tiles)
    return out[0, 0]


# ----------------------------- host-side layout (no XLA dispatches) -------------------------
def to_channel_tiles_np(x):
    """(..., C) float array -> (C, R, 128) channel-major f32, cells zero-padded to 8*128 tiles."""
    c = x.shape[-1]
    m = int(np.prod(x.shape[:-1]))
    mp = ((m + 1023) // 1024) * 1024                   # pad to a multiple of 8*128 lanes
    flat = np.zeros((c, mp), np.float32)
    flat[:, :m] = np.asarray(x, np.float32).reshape(m, c).T
    return flat.reshape(c, mp // 128, 128)


# ----------------------------- host-side glue (target encoding) ----------------------------
def return_target_tensor_np(bounding_boxes, feature_size=FEATURE_SIZE, num_bboxes=NUM_BBOXES):
    """NumPy port of Loss.return_target_tensor.  bounding_boxes: (B, n_obj, 2, 4)."""
    tensors = []
    for boxes in bounding_boxes:
        boxes = np.asarray(boxes, dtype=np.float32).copy()
        bx = (boxes[:, 0] + 40.0) / 80.0
        by = np.abs(boxes[:, 1] - 40.0) / 80.0
        max_x, min_x = bx.max(axis=1), bx.min(axis=1)
        max_y, min_y = by.max(axis=1), by.min(axis=1)
        cell = 1.0 / feature_size
        tt = np.zeros((feature_size, feature_size, num_bboxes * 5), np.float32)
        wh = np.stack([max_x - min_x, max_y - min_y], 1)
        xy = np.stack([max_x + min_x, max_y + min_y], 1) / 2.0
        for b in range(boxes.shape[0]):
            ij = np.ceil(xy[b] / cell) - 1.0
            i, j = int(ij[0]), int(ij[1])
            x0y0 = ij * cell
            xy_n = (xy[b] - x0y0) / cell
            if tt[j, i, 4] == 0:
                for k in range(2):
                    s = 5 * k
                    tt[j, i, s:s + 2] = xy_n
                    tt[j, i, s + 2:s + 4] = wh[b]
                    tt[j, i, s + 4] = 1.0
            else:
                s = 5
                tt[j, i, s:s + 2] = xy_n
                tt[j, i, s + 2:s + 4] = wh[b]
                tt[j, i, s + 4] = 1.0
        tensors.append(tt)
    return np.stack(tensors)


# ----------------------------- NumPy reference (mirrors the torch forward) ------------------
def _compute_iou_np(b1, b2):
    box1 = np.concatenate([b1[:, :2] - b1[:, 2:] ** 2, b1[:, :2] + b1[:, 2:] ** 2], 1)
    box2 = np.concatenate([b2[:, :2] - b2[:, 2:] ** 2, b2[:, :2] + b2[:, 2:] ** 2], 1)
    tl = np.maximum(box1[:, None, :2], box2[None, :, :2])
    br = np.minimum(box1[:, None, 2:], box2[None, :, 2:])
    wh = np.clip(br - tl, 0.0, None)
    inter = wh[..., 0] * wh[..., 1]
    area1 = (box1[:, 2] - box1[:, 0]) * (box1[:, 3] - box1[:, 1])
    area2 = (box2[:, 2] - box2[:, 0]) * (box2[:, 3] - box2[:, 1])
    return inter / (area1[:, None] + area2[None, :] - inter)


def loss_ref_np(pred, targ):
    b = pred.shape[0]
    pred = pred.reshape(b, -1, 5 * NUM_BBOXES).astype(np.float64)
    targ = targ.reshape(b, -1, 5 * NUM_BBOXES).astype(np.float64)
    coord_mask = targ[:, :, 4] > 0
    noobj_mask = targ[:, :, 4] == 0
    coord_target = targ[coord_mask].reshape(-1, 10)
    coord_pred = pred[coord_mask].reshape(-1, 10)
    box_pred = coord_pred.reshape(-1, 5)
    box_target = coord_target.reshape(-1, 5)
    noobj_target = targ[noobj_mask].reshape(-1, 10)
    noobj_pred = pred[noobj_mask].reshape(-1, 10)
    noobj_loss = np.sum((noobj_pred[:, [4, 9]] - noobj_target[:, [4, 9]]) ** 2)
    contain = position = dimension = 0.0
    for i in range(0, box_target.shape[0], NUM_BBOXES):
        iou = _compute_iou_np(box_pred[i:i + NUM_BBOXES, :4], box_target[i:i + NUM_BBOXES, :4])
        r = int(np.argmax(iou[:, 0]))
        pr, tr = box_pred[i + r], box_target[i + r]
        contain += (pr[4] - tr[4]) ** 2
        position += np.sum((pr[:2] - tr[:2]) ** 2)
        dimension += np.sum((np.sqrt(pr[2:4]) - np.sqrt(tr[2:4])) ** 2)
    return (LAMBDA_COORD * position + LAMBDA_COORD * dimension
            + contain + LAMBDA_NOOBJ * noobj_loss)


# ----------------------------- main ---------------------------------------------------------
if __name__ == "__main__":
    key = jax.random.PRNGKey(0)
    k_box, k_pred = jax.random.split(key)

    batch, n_obj = 2, 3
    # synthetic ground-truth corner coordinates in world space [-39, 39] (as the module expects)
    bounding_boxes = np.asarray(
        jax.random.uniform(k_box, (batch, n_obj, 2, 4), minval=-39.0, maxval=39.0),
        dtype=np.float32)
    # synthetic network predictions in [0, 1) — (B, S, S, 5*num_bboxes)
    pred_np = np.asarray(
        jax.random.uniform(k_pred, (batch, FEATURE_SIZE, FEATURE_SIZE, 5 * NUM_BBOXES),
                           minval=0.0, maxval=1.0),
        dtype=np.float32)

    target_np = return_target_tensor_np(bounding_boxes)          # (B, S, S, 10)

    # host-side re-layout to per-channel (8,128) tiles; the jit only runs the Pallas kernel
    pred_tiles = jnp.asarray(to_channel_tiles_np(pred_np))       # (10, 8, 128)
    targ_tiles = jnp.asarray(to_channel_tiles_np(target_np))     # (10, 8, 128)

    loss = yolo_loss_pallas(pred_tiles, targ_tiles)
    loss = jax.block_until_ready(loss)

    ref = loss_ref_np(pred_np, target_np)
    assert np.allclose(float(loss), ref, rtol=2e-3, atol=1e-3), (float(loss), ref)
    print("KERNEL_OK")
</pallas_src>

<mosaic_0001>
module attributes {stable_mosaic.version = 11 : i64} {
  func.func @_loss_kernel(%arg0: memref<10x8x128xf32, #tpu.memory_space<vmem>>, %arg1: memref<10x8x128xf32, #tpu.memory_space<vmem>>, %arg2: memref<1x1xf32, #tpu.memory_space<smem>>) attributes {dimension_semantics = [], scalar_prefetch = 0 : i64, scratch_operands = 0 : i64, tpu.core_type = #tpu.core_type<tc>} {
    %c0 = arith.constant 0 : index
    %c0_0 = arith.constant 0 : index
    %c0_1 = arith.constant 0 : index
    %0 = vector.load %arg0[%c0, %c0_0, %c0_1] : memref<10x8x128xf32, #tpu.memory_space<vmem>>, vector<1x8x128xf32>
    %1 = vector.shape_cast %0 : vector<1x8x128xf32> to vector<8x128xf32>
    %c1 = arith.constant 1 : index
    %c0_2 = arith.constant 0 : index
    %c0_3 = arith.constant 0 : index
    %2 = vector.load %arg0[%c1, %c0_2, %c0_3] : memref<10x8x128xf32, #tpu.memory_space<vmem>>, vector<1x8x128xf32>
    %3 = vector.shape_cast %2 : vector<1x8x128xf32> to vector<8x128xf32>
    %c2 = arith.constant 2 : index
    %c0_4 = arith.constant 0 : index
    %c0_5 = arith.constant 0 : index
    %4 = vector.load %arg0[%c2, %c0_4, %c0_5] : memref<10x8x128xf32, #tpu.memory_space<vmem>>, vector<1x8x128xf32>
    %5 = vector.shape_cast %4 : vector<1x8x128xf32> to vector<8x128xf32>
    %c3 = arith.constant 3 : index
    %c0_6 = arith.constant 0 : index
    %c0_7 = arith.constant 0 : index
    %6 = vector.load %arg0[%c3, %c0_6, %c0_7] : memref<10x8x128xf32, #tpu.memory_space<vmem>>, vector<1x8x128xf32>
    %7 = vector.shape_cast %6 : vector<1x8x128xf32> to vector<8x128xf32>
    %c4 = arith.constant 4 : index
    %c0_8 = arith.constant 0 : index
    %c0_9 = arith.constant 0 : index
    %8 = vector.load %arg0[%c4, %c0_8, %c0_9] : memref<10x8x128xf32, #tpu.memory_space<vmem>>, vector<1x8x128xf32>
    %9 = vector.shape_cast %8 : vector<1x8x128xf32> to vector<8x128xf32>
    %c5 = arith.constant 5 : index
    %c0_10 = arith.constant 0 : index
    %c0_11 = arith.constant 0 : index
    %10 = vector.load %arg0[%c5, %c0_10, %c0_11] : memref<10x8x128xf32, #tpu.memory_space<vmem>>, vector<1x8x128xf32>
    %11 = vector.shape_cast %10 : vector<1x8x128xf32> to vector<8x128xf32>
    %c6 = arith.constant 6 : index
    %c0_12 = arith.constant 0 : index
    %c0_13 = arith.constant 0 : index
    %12 = vector.load %arg0[%c6, %c0_12, %c0_13] : memref<10x8x128xf32, #tpu.memory_space<vmem>>, vector<1x8x128xf32>
    %13 = vector.shape_cast %12 : vector<1x8x128xf32> to vector<8x128xf32>
    %c7 = arith.constant 7 : index
    %c0_14 = arith.constant 0 : index
    %c0_15 = arith.constant 0 : index
    %14 = vector.load %arg0[%c7, %c0_14, %c0_15] : memref<10x8x128xf32, #tpu.memory_space<vmem>>, vector<1x8x128xf32>
    %15 = vector.shape_cast %14 : vector<1x8x128xf32> to vector<8x128xf32>
    %c8 = arith.constant 8 : index
    %c0_16 = arith.constant 0 : index
    %c0_17 = arith.constant 0 : index
    %16 = vector.load %arg0[%c8, %c0_16, %c0_17] : memref<10x8x128xf32, #tpu.memory_space<vmem>>, vector<1x8x128xf32>
    %17 = vector.shape_cast %16 : vector<1x8x128xf32> to vector<8x128xf32>
    %c9 = arith.constant 9 : index
    %c0_18 = arith.constant 0 : index
    %c0_19 = arith.constant 0 : index
    %18 = vector.load %arg0[%c9, %c0_18, %c0_19] : memref<10x8x128xf32, #tpu.memory_space<vmem>>, vector<1x8x128xf32>
    %19 = vector.shape_cast %18 : vector<1x8x128xf32> to vector<8x128xf32>
    %c0_20 = arith.constant 0 : index
    %c0_21 = arith.constant 0 : index
    %c0_22 = arith.constant 0 : index
    %20 = vector.load %arg1[%c0_20, %c0_21, %c0_22] : memref<10x8x128xf32, #tpu.memory_space<vmem>>, vector<1x8x128xf32>
    %21 = vector.shape_cast %20 : vector<1x8x128xf32> to vector<8x128xf32>
    %c1_23 = arith.constant 1 : index
    %c0_24 = arith.constant 0 : index
    %c0_25 = arith.constant 0 : index
    %22 = vector.load %arg1[%c1_23, %c0_24, %c0_25] : memref<10x8x128xf32, #tpu.memory_space<vmem>>, vector<1x8x128xf32>
    %23 = vector.shape_cast %22 : vector<1x8x128xf32> to vector<8x128xf32>
    %c2_26 = arith.constant 2 : index
    %c0_27 = arith.constant 0 : index
    %c0_28 = arith.constant 0 : index
    %24 = vector.load %arg1[%c2_26, %c0_27, %c0_28] : memref<10x8x128xf32, #tpu.memory_space<vmem>>, vector<1x8x128xf32>
    %25 = vector.shape_cast %24 : vector<1x8x128xf32> to vector<8x128xf32>
    %c3_29 = arith.constant 3 : index
    %c0_30 = arith.constant 0 : index
    %c0_31 = arith.constant 0 : index
    %26 = vector.load %arg1[%c3_29, %c0_30, %c0_31] : memref<10x8x128xf32, #tpu.memory_space<vmem>>, vector<1x8x128xf32>
    %27 = vector.shape_cast %26 : vector<1x8x128xf32> to vector<8x128xf32>
    %c4_32 = arith.constant 4 : index
    %c0_33 = arith.constant 0 : index
    %c0_34 = arith.constant 0 : index
    %28 = vector.load %arg1[%c4_32, %c0_33, %c0_34] : memref<10x8x128xf32, #tpu.memory_space<vmem>>, vector<1x8x128xf32>
    %29 = vector.shape_cast %28 : vector<1x8x128xf32> to vector<8x128xf32>
    %c5_35 = arith.constant 5 : index
    %c0_36 = arith.constant 0 : index
    %c0_37 = arith.constant 0 : index
    %30 = vector.load %arg1[%c5_35, %c0_36, %c0_37] : memref<10x8x128xf32, #tpu.memory_space<vmem>>, vector<1x8x128xf32>
    %31 = vector.shape_cast %30 : vector<1x8x128xf32> to vector<8x128xf32>
    %c6_38 = arith.constant 6 : index
    %c0_39 = arith.constant 0 : index
    %c0_40 = arith.constant 0 : index
    %32 = vector.load %arg1[%c6_38, %c0_39, %c0_40] : memref<10x8x128xf32, #tpu.memory_space<vmem>>, vector<1x8x128xf32>
    %33 = vector.shape_cast %32 : vector<1x8x128xf32> to vector<8x128xf32>
    %c7_41 = arith.constant 7 : index
    %c0_42 = arith.constant 0 : index
    %c0_43 = arith.constant 0 : index
    %34 = vector.load %arg1[%c7_41, %c0_42, %c0_43] : memref<10x8x128xf32, #tpu.memory_space<vmem>>, vector<1x8x128xf32>
    %35 = vector.shape_cast %34 : vector<1x8x128xf32> to vector<8x128xf32>
    %c8_44 = arith.constant 8 : index
    %c0_45 = arith.constant 0 : index
    %c0_46 = arith.constant 0 : index
    %36 = vector.load %arg1[%c8_44, %c0_45, %c0_46] : memref<10x8x128xf32, #tpu.memory_space<vmem>>, vector<1x8x128xf32>
    %37 = vector.shape_cast %36 : vector<1x8x128xf32> to vector<8x128xf32>
    %c9_47 = arith.constant 9 : index
    %c0_48 = arith.constant 0 : index
    %c0_49 = arith.constant 0 : index
    %38 = vector.load %arg1[%c9_47, %c0_48, %c0_49] : memref<10x8x128xf32, #tpu.memory_space<vmem>>, vector<1x8x128xf32>
    %39 = vector.shape_cast %38 : vector<1x8x128xf32> to vector<8x128xf32>
    %cst = arith.constant 0.000000e+00 : f32
    %40 = vector.broadcast %cst : f32 to vector<8x128xf32>
    %41 = arith.cmpf ogt, %29, %40 : vector<8x128xf32>
    %42 = arith.subf %9, %29 : vector<8x128xf32>
    %43 = arith.subf %19, %39 : vector<8x128xf32>
    %44 = arith.mulf %42, %42 : vector<8x128xf32>
    %45 = arith.mulf %43, %43 : vector<8x128xf32>
    %46 = arith.addf %44, %45 : vector<8x128xf32>
    %47 = arith.mulf %25, %25 : vector<8x128xf32>
    %48 = arith.mulf %27, %27 : vector<8x128xf32>
    %49 = arith.subf %21, %47 : vector<8x128xf32>
    %50 = arith.subf %23, %48 : vector<8x128xf32>
    %51 = arith.addf %21, %47 : vector<8x128xf32>
    %52 = arith.addf %23, %48 : vector<8x128xf32>
    %53 = arith.subf %51, %49 : vector<8x128xf32>
    %54 = arith.subf %52, %50 : vector<8x128xf32>
    %55 = arith.mulf %53, %54 : vector<8x128xf32>
    %56 = arith.mulf %5, %5 : vector<8x128xf32>
    %57 = arith.mulf %7, %7 : vector<8x128xf32>
    %58 = arith.subf %1, %56 : vector<8x128xf32>
    %59 = arith.subf %3, %57 : vector<8x128xf32>
    %60 = arith.addf %1, %56 : vector<8x128xf32>
    %61 = arith.addf %3, %57 : vector<8x128xf32>
    %62 = arith.minimumf %60, %51 : vector<8x128xf32>
    %63 = arith.maximumf %58, %49 : vector<8x128xf32>
    %64 = arith.subf %62, %63 : vector<8x128xf32>
    %cst_50 = arith.constant 0.000000e+00 : f32
    %65 = vector.broadcast %cst_50 : f32 to vector<8x128xf32>
    %66 = arith.maximumf %64, %65 : vector<8x128xf32>
    %67 = arith.minimumf %61, %52 : vector<8x128xf32>
    %68 = arith.maximumf %59, %50 : vector<8x128xf32>
    %69 = arith.subf %67, %68 : vector<8x128xf32>
    %cst_51 = arith.constant 0.000000e+00 : f32
    %70 = vector.broadcast %cst_51 : f32 to vector<8x128xf32>
    %71 = arith.maximumf %69, %70 : vector<8x128xf32>
    %72 = arith.mulf %66, %71 : vector<8x128xf32>
    %73 = arith.subf %60, %58 : vector<8x128xf32>
    %74 = arith.subf %61, %59 : vector<8x128xf32>
    %75 = arith.mulf %73, %74 : vector<8x128xf32>
    %76 = arith.addf %75, %55 : vector<8x128xf32>
    %77 = arith.subf %76, %72 : vector<8x128xf32>
    %78 = arith.mulf %15, %15 : vector<8x128xf32>
    %79 = arith.mulf %17, %17 : vector<8x128xf32>
    %80 = arith.subf %11, %78 : vector<8x128xf32>
    %81 = arith.subf %13, %79 : vector<8x128xf32>
    %82 = arith.addf %11, %78 : vector<8x128xf32>
    %83 = arith.addf %13, %79 : vector<8x128xf32>
    %84 = arith.minimumf %82, %51 : vector<8x128xf32>
    %85 = arith.maximumf %80, %49 : vector<8x128xf32>
    %86 = arith.subf %84, %85 : vector<8x128xf32>
    %cst_52 = arith.constant 0.000000e+00 : f32
    %87 = vector.broadcast %cst_52 : f32 to vector<8x128xf32>
    %88 = arith.maximumf %86, %87 : vector<8x128xf32>
    %89 = arith.minimumf %83, %52 : vector<8x128xf32>
    %90 = arith.maximumf %81, %50 : vector<8x128xf32>
    %91 = arith.subf %89, %90 : vector<8x128xf32>
    %cst_53 = arith.constant 0.000000e+00 : f32
    %92 = vector.broadcast %cst_53 : f32 to vector<8x128xf32>
    %93 = arith.maximumf %91, %92 : vector<8x128xf32>
    %94 = arith.mulf %88, %93 : vector<8x128xf32>
    %95 = arith.subf %82, %80 : vector<8x128xf32>
    %96 = arith.subf %83, %81 : vector<8x128xf32>
    %97 = arith.mulf %95, %96 : vector<8x128xf32>
    %98 = arith.addf %97, %55 : vector<8x128xf32>
    %99 = arith.subf %98, %94 : vector<8x128xf32>
    %100 = arith.mulf %94, %77 : vector<8x128xf32>
    %101 = arith.mulf %72, %99 : vector<8x128xf32>
    %102 = arith.cmpf ogt, %100, %101 : vector<8x128xf32>
    %103 = arith.select %102, %11, %1 : vector<8x128xi1>, vector<8x128xf32>
    %104 = arith.select %102, %13, %3 : vector<8x128xi1>, vector<8x128xf32>
    %105 = arith.select %102, %15, %5 : vector<8x128xi1>, vector<8x128xf32>
    %106 = arith.select %102, %17, %7 : vector<8x128xi1>, vector<8x128xf32>
    %107 = arith.select %102, %19, %9 : vector<8x128xi1>, vector<8x128xf32>
    %108 = arith.select %102, %31, %21 : vector<8x128xi1>, vector<8x128xf32>
    %109 = arith.select %102, %33, %23 : vector<8x128xi1>, vector<8x128xf32>
    %110 = arith.select %102, %35, %25 : vector<8x128xi1>, vector<8x128xf32>
    %111 = arith.select %102, %37, %27 : vector<8x128xi1>, vector<8x128xf32>
    %112 = arith.select %102, %39, %29 : vector<8x128xi1>, vector<8x128xf32>
    %113 = arith.subf %103, %108 : vector<8x128xf32>
    %114 = arith.subf %104, %109 : vector<8x128xf32>
    %115 = arith.mulf %113, %113 : vector<8x128xf32>
    %116 = arith.mulf %114, %114 : vector<8x128xf32>
    %117 = arith.addf %115, %116 : vector<8x128xf32>
    %118 = math.sqrt %105 : vector<8x128xf32>
    %119 = math.sqrt %110 : vector<8x128xf32>
    %120 = arith.subf %118, %119 : vector<8x128xf32>
    %121 = math.sqrt %106 : vector<8x128xf32>
    %122 = math.sqrt %111 : vector<8x128xf32>
    %123 = arith.subf %121, %122 : vector<8x128xf32>
    %124 = arith.mulf %120, %120 : vector<8x128xf32>
    %125 = arith.mulf %123, %123 : vector<8x128xf32>
    %126 = arith.addf %124, %125 : vector<8x128xf32>
    %127 = arith.subf %107, %112 : vector<8x128xf32>
    %128 = arith.mulf %127, %127 : vector<8x128xf32>
    %129 = arith.addf %117, %126 : vector<8x128xf32>
    %cst_54 = arith.constant 5.000000e+00 : f32
    %130 = vector.broadcast %cst_54 : f32 to vector<8x128xf32>
    %131 = arith.mulf %130, %129 : vector<8x128xf32>
    %132 = arith.addf %128, %131 : vector<8x128xf32>
    %cst_55 = arith.constant 5.000000e-01 : f32
    %133 = vector.broadcast %cst_55 : f32 to vector<8x128xf32>
    %134 = arith.mulf %133, %46 : vector<8x128xf32>
    %135 = arith.select %41, %132, %134 : vector<8x128xi1>, vector<8x128xf32>
    %136 = vector.shape_cast %135 : vector<8x128xf32> to vector<1x8x128xf32>
    %cst_56 = arith.constant dense<0.000000e+00> : vector<1xf32>
    %137 = vector.multi_reduction <add>, %136, %cst_56 [1, 2] : vector<1x8x128xf32> to vector<1xf32>
    %138 = vector.shape_cast %137 : vector<1xf32> to vector<1x1x1xf32>
    %139 = vector.extract %138[0, 0, 0] : f32 from vector<1x1x1xf32>
    %c0_57 = arith.constant 0 : index
    %c0_58 = arith.constant 0 : index
    %140 = memref.load %arg2[%c0_57, %c0_58] : memref<1x1xf32, #tpu.memory_space<smem>>
    memref.store %139, %arg2[%c0_57, %c0_58] : memref<1x1xf32, #tpu.memory_space<smem>>
    return
  }
}

</mosaic_0001>

<bundles_post_ra>
// kernel: yolo_loss_pallas.1
= control target key start
LH: loop header
LB: loop body
LE: loop exit
PB: predicated region body
PF: predicated region fallthrough
CT: control target
= control target key end

     0   :  { %7 = vsyncpa [#allocation3], 0  ;;  %s387_s0 = inlined_call_operand.hbm [shape: f32[10,8,128], index: 0, kind: input, shape index: {}]   ;;  %s388_s1 = inlined_call_operand.hbm [shape: f32[10,8,128], index: 1, kind: input, shape index: {}]   ;;  %s389_s2 = inlined_call_operand.hbm [shape: f32[1,1], index: 2, kind: output, shape index: {}]  }
   0x1   :  { %8 = vsyncpa [#allocation6], 0 }
   0x2   :  { %9 = vsyncpa [#allocation4], 0  ;;  %s286_s9 = smov [#allocation2]  }
   0x3   :  { %s15_s10 = sshll.u32 %s286_s9, 4  ;;  %s16_s10 = int_to_ptr.vmem [resolvable:$true] %s15_s10 }
   0x4   :  { %s240_s11 = scalar_lea.vmem %s16_s10, 1280  ;;  %p245_p1 = scmp.lt.s32.totalorder %s16_s10, %s16_s10 }
   0x5   :  { %p241_p0 = scmp.ne.s32.totalorder %s16_s10, %s240_s11  ;;  %p246_p2 = scmp.lt.s32.totalorder %s240_s11, %s240_s11 }
   0x7   :  { %p247_p3 = por %p246_p2, %p245_p1 }
   0x9   :  { %p248_p4 = pnand %p247_p3, %p241_p0 }
   0xb   :  { %251 = shalt.err (!%p248_p4)
}
   0xc   :  { %s287_s12 = smov 128   ;;  %s288_s13 = smov 8  }
   0xd   :  { %21 = dma.hbm_to_vmem [thread:$0]  %s387_s0, 1280, %s16_s10, [#allocation3], %s287_s12, %s287_s12, %s288_s13  }
   0xe   :  { %s289_s16 = smov [#allocation5]  }
   0xf   :  { %s27_s17 = sshll.u32 %s289_s16, 4  ;;  %s28_s17 = int_to_ptr.vmem [resolvable:$true] %s27_s17 }
  0x10   :  { %s260_s18 = scalar_lea.vmem %s28_s17, 1280  ;;  %p265_p6 = scmp.lt.s32.totalorder %s28_s17, %s28_s17 }
  0x11   :  { %p261_p5 = scmp.ne.s32.totalorder %s28_s17, %s260_s18  ;;  %p266_p7 = scmp.lt.s32.totalorder %s260_s18, %s260_s18 }
  0x13   :  { %p267_p8 = por %p266_p7, %p265_p6 }
  0x15   :  { %p268_p9 = pnand %p267_p8, %p261_p5 }
  0x17   :  { %271 = shalt.err (!%p268_p9)
}
  0x18   :  { %33 = dma.hbm_to_vmem [thread:$0]  %s388_s1, 1280, %s28_s17, [#allocation6], %s287_s12, %s287_s12, %s288_s13  }
  0x19   :  { %280 = dma.done.wait [#allocation3], 1280  }
  0x1a   :  { %281 = vsyncadd [#allocation3], 4294966016 }
  0x1b   :  { %282 = dma.done.wait [#allocation6], 1280  }
  0x1c   :  { %283 = vsyncadd [#allocation6], 4294966016  ;;  %v312_v0 = vld [vmem:[#allocation2] sm:$0xff]  ;;  %v314_v1 = vld [vmem:[#allocation2 + $0x10] sm:$0xff]  ;;  %s290_s1 = smov [#allocation7]  }
  0x1d   :  { %v316_v2 = vld [vmem:[#allocation2 + $0x8] sm:$0xff]  ;;  %v318_v3 = vld [vmem:[#allocation2 + $0x18] sm:$0xff]  ;;  %v93_v4 = vmul.f32 %v314_v1, %v314_v1  ;;  %v322_v6 = vld [vmem:[#allocation2 + $0x40] sm:$0xff] }
  0x1e   :  { %v54_v5 = vld [vmem:[#allocation2 + $0x38] sm:$0xff]  ;;  %v94_v7 = vmul.f32 %v318_v3, %v318_v3  ;;  %v326_v8 = vld [vmem:[#allocation2 + $0x28] sm:$0xff]  ;;  %v328_v9 = vld [vmem:[#allocation5] sm:$0xff]  ;;  %v114_v18 = vmul.f32 %v322_v6, %v322_v6 }
  0x1f   :  { %v95_v10 = vsub.f32 %v312_v0, %v93_v4  ;;  %v113_v11 = vmul.f32 %v54_v5, %v54_v5  ;;  %v331_v12 = vld [vmem:[#allocation5 + $0x8] sm:$0xff]  ;;  %v63_v13 = vld [vmem:[#allocation5 + $0x10] sm:$0xff]  ;;  %v65_v14 = vld [vmem:[#allocation5 + $0x18] sm:$0xff]  ;;  %v97_v16 = vadd.f32 %v93_v4, %v312_v0 }
  0x20   :  { %v96_v15 = vsub.f32 %v316_v2, %v94_v7  ;;  %v98_v17 = vadd.f32 %v94_v7, %v316_v2  ;;  %v338_v19 = vld [vmem:[#allocation2 + $0x30] sm:$0xff]  ;;  %v84_v20 = vmul.f32 %v63_v13, %v63_v13  ;;  %v85_v21 = vmul.f32 %v65_v14, %v65_v14  ;;  %v73_v63 = vld [vmem:[#allocation5 + $0x38] sm:$0xff] }
  0x21   :  { %v108_v22 = vsub.f32 %v97_v16, %v95_v10  ;;  %v115_v26 = vsub.f32 %v326_v8, %v113_v11  ;;  %v116_v29 = vsub.f32 %v338_v19, %v114_v18  ;;  %v117_v30 = vadd.f32 %v113_v11, %v326_v8  ;;  %v75_v7 = vld [vmem:[#allocation5 + $0x40] sm:$0xff] }
  0x22   :  { %v109_v23 = vsub.f32 %v98_v17, %v96_v15  ;;  %v86_v24 = vsub.f32 %v328_v9, %v84_v20  ;;  %v87_v25 = vsub.f32 %v331_v12, %v85_v21  ;;  %v88_v27 = vadd.f32 %v84_v20, %v328_v9  ;;  %v48_v20 = vld [vmem:[#allocation2 + $0x20] sm:$0xff] }
  0x23   :  { %v89_v28 = vadd.f32 %v85_v21, %v331_v12  ;;  %v118_v34 = vadd.f32 %v114_v18, %v338_v19  ;;  %v128_v47 = vsub.f32 %v117_v30, %v115_v26  ;;  %v71_v18 = vld [vmem:[#allocation5 + $0x30] sm:$0xff]  ;;  %v58_v21 = vld [vmem:[#allocation2 + $0x48] sm:$0xff] }
  0x24   :  { %v100_v31 = vmax.f32 %v95_v10, %v86_v24  ;;  %v104_v32 = vmax.f32 %v96_v15, %v87_v25  ;;  %v110_v33 = vmul.f32 %v109_v23, %v108_v22  ;;  %v90_v35 = vsub.f32 %v88_v27, %v86_v24 }
  0x25   :  { %v91_v36 = vsub.f32 %v89_v28, %v87_v25  ;;  %v99_v37 = vmin.f32 %v97_v16, %v88_v27  ;;  %v103_v38 = vmin.f32 %v98_v17, %v89_v28  ;;  %v119_v39 = vmin.f32 %v117_v30, %v88_v27  ;;  %v69_v17 = vld [vmem:[#allocation5 + $0x28] sm:$0xff] }
  0x26   :  { %v120_v40 = vmax.f32 %v115_v26, %v86_v24  ;;  %v123_v41 = vmin.f32 %v118_v34, %v89_v28  ;;  %v124_v45 = vmax.f32 %v116_v29, %v87_v25  ;;  %v129_v48 = vsub.f32 %v118_v34, %v116_v29 }
  0x27   :  { %v92_v42 = vmul.f32 %v91_v36, %v90_v35  ;;  %v101_v43 = vsub.f32 %v99_v37, %v100_v31  ;;  %v105_v44 = vsub.f32 %v103_v38, %v104_v32 }
  0x28   :  { %v121_v46 = vsub.f32 %v119_v39, %v120_v40  ;;  %v125_v52 = vsub.f32 %v123_v41, %v124_v45  ;;  %v130_v54 = vmul.f32 %v129_v48, %v128_v47 }
  0x29   :  { %v102_v49 = vmax.f32 %v101_v43, 0.0  ;;  %v106_v50 = vmax.f32 %v105_v44, 0.0  ;;  %v111_v51 = vadd.f32 %v110_v33, %v92_v42 }
  0x2a   :  { %v122_v53 = vmax.f32 %v121_v46, 0.0  ;;  %v126_v56 = vmax.f32 %v125_v52, 0.0  ;;  %v131_v57 = vadd.f32 %v130_v54, %v92_v42 }
  0x2b   :  { %v107_v55 = vmul.f32 %v106_v50, %v102_v49 }
  0x2c   :  { %v127_v59 = vmul.f32 %v126_v56, %v122_v53 }
  0x2d   :  { %v112_v58 = vsub.f32 %v111_v51, %v107_v55 }
  0x2e   :  { %v132_v60 = vsub.f32 %v131_v57, %v127_v59 }
  0x2f   :  { %v133_v61 = vmul.f32 %v127_v59, %v112_v58 }
  0x30   :  { %v134_v62 = vmul.f32 %v132_v60, %v107_v55 }
  0x32   :  { %vm348_vm0 = vcmp.gt.f32.partialorder %v133_v61, %v134_v62 }
  0x33   :  { %v138_v10 = vsel %vm348_vm0, %v54_v5, %v314_v1  ;;  %v143_v11 = vsel %vm348_vm0, %v73_v63, %v63_v13  ;;  %v139_v15 = vsel %vm348_vm0, %v322_v6, %v318_v3  ;;  %v144_v16 = vsel %vm348_vm0, %v75_v7, %v65_v14  ;;  %v67_v1 = vld [vmem:[#allocation5 + $0x20] sm:$0xff]  ;;  %v77_v5 = vld [vmem:[#allocation5 + $0x48] sm:$0xff] }
  0x34   :  { %224 = vrsqrt.f32 %v138_v10  ;;  %v136_v13 = vsel %vm348_vm0, %v326_v8, %v312_v0  ;;  %v141_v3 = vsel %vm348_vm0, %v69_v17, %v328_v9  ;;  %v137_v6 = vsel %vm348_vm0, %v338_v19, %v316_v2 }
  0x35   :  { %226 = vrsqrt.f32 %v143_v11  ;;  %v142_v14 = vsel %vm348_vm0, %v71_v18, %v331_v12  ;;  %v79_v22 = vsub.f32 %v48_v20, %v67_v1  ;;  %v80_v23 = vsub.f32 %v58_v21, %v77_v5 }
  0x36   :  { %228 = vrsqrt.f32 %v139_v15  ;;  %v146_v24 = vsub.f32 %v136_v13, %v141_v3  ;;  %v147_v26 = vsub.f32 %v137_v6, %v142_v14  ;;  %vm153_vm1 = vcmp.eq.f32.partialorder %v138_v10, inf }
  0x37   :  { %230 = vrsqrt.f32 %v144_v16  ;;  %vm155_vm2 = vcmp.eq.f32.partialorder %v138_v10, 0.0  ;;  %v156_v0 = vand.u32 2147483648, %v138_v10  ;;  %vm160_vm3 = vcmp.eq.f32.partialorder %v143_v11, inf }
  0x38   :  { %vm162_vm4 = vcmp.eq.f32.partialorder %v143_v11, 0.0  ;;  %v163_v9 = vand.u32 2147483648, %v143_v11  ;;  %vm168_vm5 = vcmp.eq.f32.partialorder %v139_v15, inf  ;;  %vm170_vm6 = vcmp.eq.f32.partialorder %v139_v15, 0.0 }
  0x39   :  { %v171_v2 = vand.u32 2147483648, %v139_v15  ;;  %vm175_vm7 = vcmp.eq.f32.partialorder %v144_v16, inf  ;;  %v178_v31 = vand.u32 2147483648, %v144_v16  ;;  %vm177_vm8 = vcmp.eq.f32.partialorder %v144_v16, 0.0 }
  0x3a   :  { %v148_v35 = vmul.f32 %v146_v24, %v146_v24  ;;  %v149_v38 = vmul.f32 %v147_v26, %v147_v26  ;;  %v140_v42 = vsel %vm348_vm0, %v58_v21, %v48_v20  ;;  %v145_v43 = vsel %vm348_vm0, %v77_v5, %v67_v1 }
  0x3b   :  { %v81_v45 = vmul.f32 %v79_v22, %v79_v22  ;;  %v82_v46 = vmul.f32 %v80_v23, %v80_v23  ;;  %v184_v51 = vsub.f32 %v140_v42, %v145_v43  ;;  %vm78_vm9 = vcmp.gt.f32.partialorder %v67_v1, 0.0 }
  0x3c   :  { %v150_v49 = vadd.f32 %v149_v38, %v148_v35 }
  0x3d   :  { %v83_v52 = vadd.f32 %v82_v46, %v81_v45  ;;  %v185_v54 = vmul.f32 %v184_v51, %v184_v51 }
  0x3f   :  { %v189_v57 = vmul.f32 0.5, %v83_v52 }
  0x41   :  { %v225_v25 = vpop.eup %224 }
  0x42   :  { %v227_v8 = vpop.eup %226  ;;  %v152_v27 = vmul.f32 %v225_v25, %v138_v10 }
  0x43   :  { %v229_v28 = vpop.eup %228  ;;  %v159_v29 = vmul.f32 %v227_v8, %v143_v11 }
  0x44   :  { %v231_v19 = vpop.eup %230  ;;  %v154_v12 = vsel %vm153_vm1, %v138_v10, %v152_v27  ;;  %v167_v30 = vmul.f32 %v229_v28, %v139_v15 }
  0x45   :  { %v157_v32 = vsel %vm155_vm2, %v156_v0, %v154_v12  ;;  %v161_v33 = vsel %vm160_vm3, %v143_v11, %v159_v29  ;;  %v174_v34 = vmul.f32 %v231_v19, %v144_v16 }
  0x46   :  { %v164_v36 = vsel %vm162_vm4, %v163_v9, %v161_v33  ;;  %v169_v37 = vsel %vm168_vm5, %v139_v15, %v167_v30 }
  0x47   :  { %v165_v39 = vsub.f32 %v157_v32, %v164_v36  ;;  %v172_v40 = vsel %vm170_vm6, %v171_v2, %v169_v37  ;;  %v176_v41 = vsel %vm175_vm7, %v144_v16, %v174_v34 }
  0x48   :  { %v179_v44 = vsel %vm177_vm8, %v178_v31, %v176_v41 }
  0x49   :  { %v180_v47 = vsub.f32 %v172_v40, %v179_v44  ;;  %v181_v48 = vmul.f32 %v165_v39, %v165_v39 }
  0x4b   :  { %v182_v50 = vmul.f32 %v180_v47, %v180_v47 }
  0x4d   :  { %v183_v53 = vadd.f32 %v182_v50, %v181_v48 }
  0x4f   :  { %v186_v55 = vadd.f32 %v183_v53, %v150_v49 }
  0x51   :  { %v187_v56 = vmul.f32 5.0, %v186_v55 }
  0x53   :  { %v188_v58 = vadd.f32 %v187_v56, %v185_v54 }
  0x55   :  { %v190_v59 = vsel %vm78_vm9, %v188_v58, %v189_v57 }
  0x56   :  { %191 = vadd.xlane.f32.xlu0 %v190_v59 }
  0xdf   :  { %v192_v60 = vpop.xlane.xlu0 %191 }
  0xe0   :  { %v193_v61 = vrot.slane %v192_v60, 4 }
  0xe2   :  { %v194_v62 = vadd.f32 %v193_v61, %v192_v60 }
  0xe4   :  { %v195_v63 = vrot.slane %v194_v62, 2 }
  0xe6   :  { %v196_v4 = vadd.f32 %v195_v63, %v194_v62 }
  0xe8   :  { %v197_v7 = vrot.slane %v196_v4, 1 }
  0xea   :  { %v198_v10 = vadd.f32 %v197_v7, %v196_v4 }
  0xec   :  { %217 = vpush %v198_v10 }
 0x11d   :  { %s218_s0 = spop %217 }
 0x11e   :  { %201 = sst [smem:[#allocation7]] %s218_s0 }
 0x11f   :  { %209 = dma.smem_to_hbm %s290_s1, 16, %s389_s2, [#allocation4]  }
 0x120   :  { %284 = dma.done.wait [#allocation4], 16  }
 0x121   :  { %285 = vsyncadd [#allocation4], 4294967280 }
 0x122   :  { %213 = sfence }
 0x123   :  { %214 = vsyncpa [#allocation3], 1 }
 0x124   :  { %215 = vsyncpa [#allocation6], 1 }
 0x125   :  { %216 = vsyncpa [#allocation4], 1 }

</bundles_post_ra>
